<compile_context>
chip_gen: v6e
topology: v6e:2x2x1
jax: 0.10.0
libtpu: 0.0.40
codegen_flags: <defaults>
</compile_context>

<pallas_src>
import functools

import numpy as np
import jax
import jax.numpy as jnp
from jax.experimental import pallas as pl
from jax.experimental.pallas import tpu as pltpu

VMEM = pl.BlockSpec(memory_space=pltpu.MemorySpace.VMEM)
OUT_LANES = 128  # lane-dense packed-output width


def _logsumexp(x, axis):
    mx = jnp.max(x, axis=axis, keepdims=True)
    return mx + jnp.log(jnp.sum(jnp.exp(x - mx), axis=axis, keepdims=True))


# ----------------------------------------------------------------------------
# Fused kernel: both particle filters (batched matmuls), crossmodal weight
# model, blackout masking and fusion — all intermediates stay in VMEM.
# ----------------------------------------------------------------------------
def fused_pf_kernel(states_ref, logw_ref, ctrl_ref, obs_ref,
                    w1_ref, wc_ref, b1_ref, w2_ref, b2_ref,
                    wo_ref, bo_ref, wm_ref, bm_ref,
                    slab_ref, states_out_ref,
                    *, know_image_blackout, img_px):
    N, P, S = states_ref.shape
    NP = N * P
    HH = w1_ref.shape[1]          # stacked padded hidden width (image half | force half)
    FF = wm_ref.shape[1]          # stacked padded measurement-feature width
    half_f = FF // 2

    x3 = states_ref[...]                                   # (N, P, S)
    x2 = x3.reshape(NP, S)
    lwp = logw_ref[...]                                    # (N, P)

    # ---- dynamics for BOTH modalities in one set of matmuls (lane-stacked weights) ----
    xh = jnp.dot(x2, w1_ref[...], preferred_element_type=jnp.float32)            # (NP, HH)
    cf = jnp.dot(ctrl_ref[...], wc_ref[...], preferred_element_type=jnp.float32)  # (N, HH)
    # implicit broadcast of control features over particles (no materialized temp)
    h = jnp.tanh(xh.reshape(N, P, HH) + cf[:, None, :] + b1_ref[...])            # (N, P, HH)
    delta = jnp.dot(h.reshape(NP, HH), w2_ref[...],
                    preferred_element_type=jnp.float32) + b2_ref[...]             # (NP, 2S)
    spcat2 = jnp.concatenate([x2, x2], axis=1) + delta                            # (NP, 2S)

    # ---- observation features for both modalities + weight-model logits, one matmul ----
    pre = jnp.dot(obs_ref[...], wo_ref[...],
                  preferred_element_type=jnp.float32) + bo_ref[...]               # (N, FF+128)
    obs_feat = jnp.tanh(pre[:, :FF])                                              # (N, FF)
    logits = pre[:, FF:FF + 2]                                                    # (N, 2)
    log_betas = logits - _logsumexp(logits, axis=1)        # log_softmax (use_log_softmax=True)
    ib = log_betas[:, 0:1]                                                        # (N, 1)
    fb = log_betas[:, 1:2]                                                        # (N, 1)

    if know_image_blackout:
        blackout = jnp.sum(jnp.abs(obs_ref[:, :img_px]), axis=1, keepdims=True) < 1e-8
        mask = jnp.where(blackout, 0.0, 1.0)
        ib = jnp.where(blackout, np.log(1e-9), 0.0) + mask * ib
        fb = jnp.where(blackout, np.log(1.0 - 1e-9), 0.0) + mask * fb

    # ---- measurement model for both modalities (block-diagonal packed weights) ----
    m = jnp.tanh(jnp.dot(spcat2, wm_ref[...],
                         preferred_element_type=jnp.float32) + bm_ref[...])       # (NP, FF)
    prod = m.reshape(N, P, FF) * obs_feat[:, None, :]                             # (N, P, FF)
    ll_img = jnp.sum(prod[..., :half_f], axis=-1)                                 # (N, P)
    ll_frc = jnp.sum(prod[..., half_f:], axis=-1)                                 # (N, P)

    # ---- per-modality log-weight update + normalisation + weighted estimates ----
    lw_img = lwp + ll_img
    lw_img = lw_img - _logsumexp(lw_img, axis=1)
    lw_frc = lwp + ll_frc
    lw_frc = lw_frc - _logsumexp(lw_frc, axis=1)

    sp3 = spcat2.reshape(N, P, 2 * S)
    sp_img = sp3[..., :S]
    sp_frc = sp3[..., S:]
    est_img = jnp.sum(jnp.exp(lw_img)[:, :, None] * sp_img, axis=1)               # (N, S)
    est_frc = jnp.sum(jnp.exp(lw_frc)[:, :, None] * sp_frc, axis=1)               # (N, S)

    # ---- fusion (exp(log_beta)-weighted estimate, particle concat, weight concat) ----
    est = jnp.exp(ib) * est_img + jnp.exp(fb) * est_frc                           # (N, S)
    lw_raw = jnp.concatenate([lw_img + ib, lw_frc + fb], axis=1)                  # (N, 2P)
    lw_norm = lw_raw - _logsumexp(lw_raw, axis=1)                                 # (N, 2P)

    states_out_ref[...] = jnp.concatenate([sp_img, sp_frc], axis=1)               # (N, 2P, S)

    # single lane-dense packed store for the narrow outputs
    used = S + 4 * P
    pad = slab_ref.shape[1] - used
    parts = [est, lw_raw, lw_norm]
    if pad > 0:
        parts.append(jnp.zeros((N, pad), jnp.float32))
    slab_ref[...] = jnp.concatenate(parts, axis=1)


def fused_forward_call(params, states_sel, logw_sel, controls, obs_flat_pad,
                       know_image_blackout, img_px):
    N, P, S = states_sel.shape
    out_lanes = max(OUT_LANES, pl.cdiv(S + 4 * P, 128) * 128)
    kernel = functools.partial(fused_pf_kernel,
                               know_image_blackout=know_image_blackout,
                               img_px=img_px)
    out_shape = (
        jax.ShapeDtypeStruct((N, out_lanes), jnp.float32),   # packed: est | lw_raw | lw_norm
        jax.ShapeDtypeStruct((N, 2 * P, S), jnp.float32),    # fused particle set
    )
    # TODO(synk): if N / M are ever scaled up, add a grid over the batch axis with
    # dimension_semantics=("parallel",) so v7x's 2 TensorCores are both used.
    slab, states_pred = pl.pallas_call(
        kernel,
        out_shape=out_shape,
        in_specs=[VMEM] * 13,
        out_specs=(VMEM, VMEM),
    )(states_sel, logw_sel, controls, obs_flat_pad,
      params['w1a'], params['wca'], params['b1a'],
      params['w2a'], params['b2a'],
      params['woa'], params['boa'],
      params['wma'], params['bma'])

    est = slab[:, :S]
    lw_raw = slab[:, S:S + 2 * P]
    lw_norm = slab[:, S + 2 * P:S + 4 * P]
    return est, states_pred, lw_raw, lw_norm


# ----------------------------------------------------------------------------
# Parameter init (deterministic, synthetic) + one-time packing / padding:
#   image & force weights stacked along lane halves (or block-diagonal where the
#   modalities must stay separate), padded to 128-lane multiples; weight-model
#   logits folded into the observation projection.
# ----------------------------------------------------------------------------
def _dense_init(key, shape, fan_in, scale=1.0):
    return jax.random.normal(key, shape, jnp.float32) * (scale / np.sqrt(fan_in))


def _init_pf_raw(key, S, H, C, Dobs, F):
    ks = jax.random.split(key, 5)
    return dict(
        w1=_dense_init(ks[0], (S, H), S),
        wc=_dense_init(ks[1], (C, H), C),
        b1=jnp.zeros((1, H), jnp.float32),
        w2=_dense_init(ks[2], (H, S), H, scale=0.1),
        b2=jnp.zeros((1, S), jnp.float32),
        wo=_dense_init(ks[3], (Dobs, F), Dobs),
        bo=jnp.zeros((1, F), jnp.float32),
        wm=_dense_init(ks[4], (S, F), S),
        bm=jnp.zeros((1, F), jnp.float32),
    )


def init_params(key, S, H, C, Dobs, F, *, HH=128, FF=128):
    assert 2 * H <= HH and 2 * F <= FF
    d_pad = int(np.ceil(Dobs / 128)) * 128     # pad the obs contraction dim once, here
    ki, kf, kw = jax.random.split(key, 3)
    img = _init_pf_raw(ki, S, H, C, Dobs, F)
    frc = _init_pf_raw(kf, S, H, C, Dobs, F)
    ww = _dense_init(kw, (Dobs, 2), Dobs)
    bw = jnp.zeros((1, 2), jnp.float32)

    hh2 = HH // 2
    ff2 = FF // 2

    w1a = (jnp.zeros((S, HH), jnp.float32)
           .at[:, :H].set(img['w1']).at[:, hh2:hh2 + H].set(frc['w1']))
    wca = (jnp.zeros((C, HH), jnp.float32)
           .at[:, :H].set(img['wc']).at[:, hh2:hh2 + H].set(frc['wc']))
    b1a = (jnp.zeros((1, HH), jnp.float32)
           .at[:, :H].set(img['b1']).at[:, hh2:hh2 + H].set(frc['b1']))
    w2a = (jnp.zeros((HH, 2 * S), jnp.float32)
           .at[:H, :S].set(img['w2']).at[hh2:hh2 + H, S:].set(frc['w2']))
    b2a = jnp.concatenate([img['b2'], frc['b2']], axis=1)
    woa = (jnp.zeros((d_pad, FF + 128), jnp.float32)
           .at[:Dobs, :F].set(img['wo'])
           .at[:Dobs, ff2:ff2 + F].set(frc['wo'])
           .at[:Dobs, FF:FF + 2].set(ww))
    boa = (jnp.zeros((1, FF + 128), jnp.float32)
           .at[:, :F].set(img['bo'])
           .at[:, ff2:ff2 + F].set(frc['bo'])
           .at[:, FF:FF + 2].set(bw))
    wma = (jnp.zeros((2 * S, FF), jnp.float32)
           .at[:S, :F].set(img['wm']).at[S:, ff2:ff2 + F].set(frc['wm']))
    bma = (jnp.zeros((1, FF), jnp.float32)
           .at[:, :F].set(img['bm']).at[:, ff2:ff2 + F].set(frc['bm']))

    return dict(w1a=w1a, wca=wca, b1a=b1a, w2a=w2a, b2a=b2a,
                woa=woa, boa=boa, wma=wma, bma=bma)


# ----------------------------------------------------------------------------
# ParticleFusionModel.forward
# ----------------------------------------------------------------------------
def particle_fusion_forward(params, states_prev, log_weights_prev, observations,
                            controls, resample=True, noisy_dynamics=True,
                            know_image_blackout=False, rng=None):
    N, M, state_dim = states_prev.shape
    assert log_weights_prev.shape == (N, M)
    if resample:
        output_particles = M
    else:
        assert M % 2 == 0
        output_particles = M // 2

    img_flat = observations['image'].reshape(N, -1)
    obs_flat = jnp.concatenate(
        [img_flat,
         observations['gripper_pos'].reshape(N, -1),
         observations['gripper_sensors'].reshape(N, -1)], axis=1)
    img_px = img_flat.shape[1]
    d_pad = params['woa'].shape[0]
    if obs_flat.shape[1] < d_pad:
        obs_flat = jnp.concatenate(
            [obs_flat, jnp.zeros((N, d_pad - obs_flat.shape[1]), jnp.float32)], axis=1)

    # TODO(synk): noisy_dynamics (stochastic process noise inside the frozen
    # sub-filters) is omitted; the synthetic sub-models are deterministic.
    sp = states_prev[:, :output_particles, :]
    lwp = log_weights_prev[:, :output_particles]

    state_estimates, states_pred, logw_raw, logw_norm = fused_forward_call(
        params, sp, lwp, controls, obs_flat, know_image_blackout, img_px)

    if resample:
        assert logw_raw.shape == (N, 2 * M)
        assert states_pred.shape == (N, 2 * M, state_dim)
        # torch.distributions.Categorical sampling -> jax.random.categorical (glue)
        idx = jax.random.categorical(rng, logw_raw, axis=-1, shape=(M, N)).T      # (N, M)
        idx_b = jnp.broadcast_to(idx[:, :, None], (N, M, state_dim))
        states = jnp.take_along_axis(states_pred, idx_b, axis=1)
        log_weights = jnp.full((N, M), -np.log(M), jnp.float32)
    else:
        states = states_pred
        log_weights = logw_norm

    return state_estimates, states, log_weights


if __name__ == "__main__":
    N, M, S = 2, 8, 4           # batch, particles, state_dim
    C, H, F = 7, 32, 16         # control dim, hidden, measurement features (logical)
    Dobs = 1 * 16 * 16 + 3 + 7  # flattened image + gripper_pos + gripper_sensors

    key = jax.random.PRNGKey(0)
    k_in, k_par, k_res = jax.random.split(key, 3)
    ks = jax.random.split(k_in, 6)

    states_prev = jax.random.normal(ks[0], (N, M, S), jnp.float32)
    log_weights_prev = jax.nn.log_softmax(
        jax.random.normal(ks[1], (N, M), jnp.float32), axis=-1)
    observations = {
        'image': jax.random.normal(ks[2], (N, 1, 16, 16), jnp.float32),
        'gripper_pos': jax.random.normal(ks[3], (N, 3), jnp.float32),
        'gripper_sensors': jax.random.normal(ks[4], (N, 7), jnp.float32),
    }
    controls = jax.random.normal(ks[5], (N, C), jnp.float32)

    params = init_params(k_par, S, H, C, Dobs, F)

    # resample=False path (deterministic): logsumexp-normalised fused weights
    est, states, logw = particle_fusion_forward(
        params, states_prev, log_weights_prev, observations, controls,
        resample=False)
    jax.block_until_ready((est, states, logw))
    assert est.shape == (N, S)
    assert states.shape == (N, M, S)
    assert logw.shape == (N, M)
    assert np.allclose(np.exp(np.asarray(logw)).sum(axis=1), 1.0, atol=1e-4)

    # resample=True path: categorical resampling of the 2M fused particles
    est_r, states_r, logw_r = particle_fusion_forward(
        params, states_prev, log_weights_prev, observations, controls,
        resample=True, rng=k_res)
    jax.block_until_ready((est_r, states_r, logw_r))
    assert est_r.shape == (N, S)
    assert states_r.shape == (N, M, S)
    assert logw_r.shape == (N, M)

    print("KERNEL_OK")
</pallas_src>

<mosaic_0001>
module attributes {stable_mosaic.version = 11 : i64} {
  func.func @fused_pf_kernel(%arg0: memref<2x4x4xf32, #tpu.memory_space<vmem>>, %arg1: memref<2x4xf32, #tpu.memory_space<vmem>>, %arg2: memref<2x7xf32, #tpu.memory_space<vmem>>, %arg3: memref<2x384xf32, #tpu.memory_space<vmem>>, %arg4: memref<4x128xf32, #tpu.memory_space<vmem>>, %arg5: memref<7x128xf32, #tpu.memory_space<vmem>>, %arg6: memref<1x128xf32, #tpu.memory_space<vmem>>, %arg7: memref<128x8xf32, #tpu.memory_space<vmem>>, %arg8: memref<1x8xf32, #tpu.memory_space<vmem>>, %arg9: memref<384x256xf32, #tpu.memory_space<vmem>>, %arg10: memref<1x256xf32, #tpu.memory_space<vmem>>, %arg11: memref<8x128xf32, #tpu.memory_space<vmem>>, %arg12: memref<1x128xf32, #tpu.memory_space<vmem>>, %arg13: memref<2x128xf32, #tpu.memory_space<vmem>>, %arg14: memref<2x8x4xf32, #tpu.memory_space<vmem>>) attributes {dimension_semantics = [], scalar_prefetch = 0 : i64, scratch_operands = 0 : i64, tpu.core_type = #tpu.core_type<tc>} {
    %c0 = arith.constant 0 : index
    %c0_0 = arith.constant 0 : index
    %c0_1 = arith.constant 0 : index
    %0 = vector.load %arg0[%c0, %c0_0, %c0_1] : memref<2x4x4xf32, #tpu.memory_space<vmem>>, vector<2x4x4xf32>
    %1 = vector.shape_cast %0 : vector<2x4x4xf32> to vector<8x4xf32>
    %c0_2 = arith.constant 0 : index
    %c0_3 = arith.constant 0 : index
    %2 = vector.load %arg1[%c0_2, %c0_3] : memref<2x4xf32, #tpu.memory_space<vmem>>, vector<2x4xf32>
    %c0_4 = arith.constant 0 : index
    %c0_5 = arith.constant 0 : index
    %3 = vector.load %arg4[%c0_4, %c0_5] : memref<4x128xf32, #tpu.memory_space<vmem>>, vector<4x128xf32>
    %cst = arith.constant dense<0.000000e+00> : vector<8x128xf32>
    %4 = tpu.matmul %1, %3, %cst {dimension_numbers = #tpu.dot_dimension_numbers<[1], [0], [0], [1], [0, 0, 1, 1], [], []>} : vector<8x4xf32>, vector<4x128xf32>, vector<8x128xf32> -> vector<8x128xf32>
    %c0_6 = arith.constant 0 : index
    %c0_7 = arith.constant 0 : index
    %5 = vector.load %arg2[%c0_6, %c0_7] : memref<2x7xf32, #tpu.memory_space<vmem>>, vector<2x7xf32>
    %c0_8 = arith.constant 0 : index
    %c0_9 = arith.constant 0 : index
    %6 = vector.load %arg5[%c0_8, %c0_9] : memref<7x128xf32, #tpu.memory_space<vmem>>, vector<7x128xf32>
    %cst_10 = arith.constant dense<0.000000e+00> : vector<2x128xf32>
    %7 = tpu.matmul %5, %6, %cst_10 {dimension_numbers = #tpu.dot_dimension_numbers<[1], [0], [0], [1], [0, 0, 1, 1], [], []>} : vector<2x7xf32>, vector<7x128xf32>, vector<2x128xf32> -> vector<2x128xf32>
    %8 = vector.shape_cast %4 : vector<8x128xf32> to vector<2x4x128xf32>
    %9 = vector.shape_cast %7 : vector<2x128xf32> to vector<2x1x128xf32>
    %10 = vector.broadcast %9 : vector<2x1x128xf32> to vector<2x4x128xf32>
    %11 = arith.addf %8, %10 : vector<2x4x128xf32>
    %c0_11 = arith.constant 0 : index
    %c0_12 = arith.constant 0 : index
    %12 = vector.load %arg6[%c0_11, %c0_12] : memref<1x128xf32, #tpu.memory_space<vmem>>, vector<1x128xf32>
    %13 = vector.shape_cast %12 : vector<1x128xf32> to vector<1x1x128xf32>
    %14 = vector.broadcast %13 : vector<1x1x128xf32> to vector<2x4x128xf32>
    %15 = arith.addf %11, %14 : vector<2x4x128xf32>
    %16 = math.tanh %15 : vector<2x4x128xf32>
    %17 = vector.shape_cast %16 : vector<2x4x128xf32> to vector<8x128xf32>
    %c0_13 = arith.constant 0 : index
    %c0_14 = arith.constant 0 : index
    %18 = vector.load %arg7[%c0_13, %c0_14] : memref<128x8xf32, #tpu.memory_space<vmem>>, vector<128x8xf32>
    %cst_15 = arith.constant dense<0.000000e+00> : vector<8x8xf32>
    %19 = tpu.matmul %17, %18, %cst_15 {dimension_numbers = #tpu.dot_dimension_numbers<[1], [0], [0], [1], [0, 0, 1, 1], [], []>} : vector<8x128xf32>, vector<128x8xf32>, vector<8x8xf32> -> vector<8x8xf32>
    %c0_16 = arith.constant 0 : index
    %c0_17 = arith.constant 0 : index
    %20 = vector.load %arg8[%c0_16, %c0_17] : memref<1x8xf32, #tpu.memory_space<vmem>>, vector<1x8xf32>
    %21 = vector.broadcast %20 : vector<1x8xf32> to vector<8x8xf32>
    %22 = arith.addf %19, %21 : vector<8x8xf32>
    %23 = tpu.concatenate %1, %1 in 1 : vector<8x4xf32>, vector<8x4xf32> -> vector<8x8xf32>
    %24 = arith.addf %23, %22 : vector<8x8xf32>
    %c0_18 = arith.constant 0 : index
    %c0_19 = arith.constant 0 : index
    %25 = vector.load %arg3[%c0_18, %c0_19] : memref<2x384xf32, #tpu.memory_space<vmem>>, vector<2x384xf32>
    %c0_20 = arith.constant 0 : index
    %c0_21 = arith.constant 0 : index
    %26 = vector.load %arg9[%c0_20, %c0_21] : memref<384x256xf32, #tpu.memory_space<vmem>>, vector<384x256xf32>
    %cst_22 = arith.constant dense<0.000000e+00> : vector<2x256xf32>
    %27 = tpu.matmul %25, %26, %cst_22 {dimension_numbers = #tpu.dot_dimension_numbers<[1], [0], [0], [1], [0, 0, 1, 1], [], []>} : vector<2x384xf32>, vector<384x256xf32>, vector<2x256xf32> -> vector<2x256xf32>
    %c0_23 = arith.constant 0 : index
    %c0_24 = arith.constant 0 : index
    %28 = vector.load %arg10[%c0_23, %c0_24] : memref<1x256xf32, #tpu.memory_space<vmem>>, vector<1x256xf32>
    %29 = vector.broadcast %28 : vector<1x256xf32> to vector<2x256xf32>
    %30 = arith.addf %27, %29 : vector<2x256xf32>
    %31 = vector.extract_strided_slice %30 {offsets = [0, 0], sizes = [2, 128], strides = [1, 1]} : vector<2x256xf32> to vector<2x128xf32>
    %32 = math.tanh %31 : vector<2x128xf32>
    %33 = vector.extract_strided_slice %30 {offsets = [0, 128], sizes = [2, 2], strides = [1, 1]} : vector<2x256xf32> to vector<2x2xf32>
    %cst_25 = arith.constant dense<0xFF800000> : vector<2xf32>
    %34 = vector.multi_reduction <maximumf>, %33, %cst_25 [1] : vector<2x2xf32> to vector<2xf32>
    %35 = vector.shape_cast %34 : vector<2xf32> to vector<2x1xf32>
    %36 = vector.broadcast %35 : vector<2x1xf32> to vector<2x2xf32>
    %37 = arith.subf %33, %36 : vector<2x2xf32>
    %38 = math.exp %37 : vector<2x2xf32>
    %cst_26 = arith.constant dense<0.000000e+00> : vector<2xf32>
    %39 = vector.multi_reduction <add>, %38, %cst_26 [1] : vector<2x2xf32> to vector<2xf32>
    %40 = vector.shape_cast %39 : vector<2xf32> to vector<2x1xf32>
    %41 = math.log %40 : vector<2x1xf32>
    %42 = arith.addf %35, %41 : vector<2x1xf32>
    %43 = vector.broadcast %42 : vector<2x1xf32> to vector<2x2xf32>
    %44 = arith.subf %33, %43 : vector<2x2xf32>
    %45 = vector.extract_strided_slice %44 {offsets = [0, 0], sizes = [2, 1], strides = [1, 1]} : vector<2x2xf32> to vector<2x1xf32>
    %46 = vector.extract_strided_slice %44 {offsets = [0, 1], sizes = [2, 1], strides = [1, 1]} : vector<2x2xf32> to vector<2x1xf32>
    %c0_27 = arith.constant 0 : index
    %c0_28 = arith.constant 0 : index
    %47 = vector.load %arg11[%c0_27, %c0_28] : memref<8x128xf32, #tpu.memory_space<vmem>>, vector<8x128xf32>
    %cst_29 = arith.constant dense<0.000000e+00> : vector<8x128xf32>
    %48 = tpu.matmul %24, %47, %cst_29 {dimension_numbers = #tpu.dot_dimension_numbers<[1], [0], [0], [1], [0, 0, 1, 1], [], []>} : vector<8x8xf32>, vector<8x128xf32>, vector<8x128xf32> -> vector<8x128xf32>
    %c0_30 = arith.constant 0 : index
    %c0_31 = arith.constant 0 : index
    %49 = vector.load %arg12[%c0_30, %c0_31] : memref<1x128xf32, #tpu.memory_space<vmem>>, vector<1x128xf32>
    %50 = vector.broadcast %49 : vector<1x128xf32> to vector<8x128xf32>
    %51 = arith.addf %48, %50 : vector<8x128xf32>
    %52 = math.tanh %51 : vector<8x128xf32>
    %53 = vector.shape_cast %52 : vector<8x128xf32> to vector<2x4x128xf32>
    %54 = vector.shape_cast %32 : vector<2x128xf32> to vector<2x1x128xf32>
    %55 = vector.broadcast %54 : vector<2x1x128xf32> to vector<2x4x128xf32>
    %56 = arith.mulf %53, %55 : vector<2x4x128xf32>
    %57 = vector.extract_strided_slice %56 {offsets = [0, 0, 0], sizes = [2, 4, 64], strides = [1, 1, 1]} : vector<2x4x128xf32> to vector<2x4x64xf32>
    %cst_32 = arith.constant dense<0.000000e+00> : vector<2x4xf32>
    %58 = vector.multi_reduction <add>, %57, %cst_32 [2] : vector<2x4x64xf32> to vector<2x4xf32>
    %59 = vector.extract_strided_slice %56 {offsets = [0, 0, 64], sizes = [2, 4, 64], strides = [1, 1, 1]} : vector<2x4x128xf32> to vector<2x4x64xf32>
    %cst_33 = arith.constant dense<0.000000e+00> : vector<2x4xf32>
    %60 = vector.multi_reduction <add>, %59, %cst_33 [2] : vector<2x4x64xf32> to vector<2x4xf32>
    %61 = arith.addf %2, %58 : vector<2x4xf32>
    %cst_34 = arith.constant dense<0xFF800000> : vector<2xf32>
    %62 = vector.multi_reduction <maximumf>, %61, %cst_34 [1] : vector<2x4xf32> to vector<2xf32>
    %63 = vector.shape_cast %62 : vector<2xf32> to vector<2x1xf32>
    %64 = vector.broadcast %63 : vector<2x1xf32> to vector<2x4xf32>
    %65 = arith.subf %61, %64 : vector<2x4xf32>
    %66 = math.exp %65 : vector<2x4xf32>
    %cst_35 = arith.constant dense<0.000000e+00> : vector<2xf32>
    %67 = vector.multi_reduction <add>, %66, %cst_35 [1] : vector<2x4xf32> to vector<2xf32>
    %68 = vector.shape_cast %67 : vector<2xf32> to vector<2x1xf32>
    %69 = math.log %68 : vector<2x1xf32>
    %70 = arith.addf %63, %69 : vector<2x1xf32>
    %71 = vector.broadcast %70 : vector<2x1xf32> to vector<2x4xf32>
    %72 = arith.subf %61, %71 : vector<2x4xf32>
    %73 = arith.addf %2, %60 : vector<2x4xf32>
    %cst_36 = arith.constant dense<0xFF800000> : vector<2xf32>
    %74 = vector.multi_reduction <maximumf>, %73, %cst_36 [1] : vector<2x4xf32> to vector<2xf32>
    %75 = vector.shape_cast %74 : vector<2xf32> to vector<2x1xf32>
    %76 = vector.broadcast %75 : vector<2x1xf32> to vector<2x4xf32>
    %77 = arith.subf %73, %76 : vector<2x4xf32>
    %78 = math.exp %77 : vector<2x4xf32>
    %cst_37 = arith.constant dense<0.000000e+00> : vector<2xf32>
    %79 = vector.multi_reduction <add>, %78, %cst_37 [1] : vector<2x4xf32> to vector<2xf32>
    %80 = vector.shape_cast %79 : vector<2xf32> to vector<2x1xf32>
    %81 = math.log %80 : vector<2x1xf32>
    %82 = arith.addf %75, %81 : vector<2x1xf32>
    %83 = vector.broadcast %82 : vector<2x1xf32> to vector<2x4xf32>
    %84 = arith.subf %73, %83 : vector<2x4xf32>
    %85 = vector.shape_cast %24 : vector<8x8xf32> to vector<2x4x8xf32>
    %86 = vector.extract_strided_slice %85 {offsets = [0, 0, 0], sizes = [2, 4, 4], strides = [1, 1, 1]} : vector<2x4x8xf32> to vector<2x4x4xf32>
    %87 = vector.extract_strided_slice %85 {offsets = [0, 0, 4], sizes = [2, 4, 4], strides = [1, 1, 1]} : vector<2x4x8xf32> to vector<2x4x4xf32>
    %88 = math.exp %72 : vector<2x4xf32>
    %89 = vector.shape_cast %88 : vector<2x4xf32> to vector<2x4x1xf32>
    %90 = vector.broadcast %89 : vector<2x4x1xf32> to vector<2x4x4xf32>
    %91 = arith.mulf %90, %86 : vector<2x4x4xf32>
    %cst_38 = arith.constant dense<0.000000e+00> : vector<2x4xf32>
    %92 = vector.multi_reduction <add>, %91, %cst_38 [1] : vector<2x4x4xf32> to vector<2x4xf32>
    %93 = math.exp %84 : vector<2x4xf32>
    %94 = vector.shape_cast %93 : vector<2x4xf32> to vector<2x4x1xf32>
    %95 = vector.broadcast %94 : vector<2x4x1xf32> to vector<2x4x4xf32>
    %96 = arith.mulf %95, %87 : vector<2x4x4xf32>
    %cst_39 = arith.constant dense<0.000000e+00> : vector<2x4xf32>
    %97 = vector.multi_reduction <add>, %96, %cst_39 [1] : vector<2x4x4xf32> to vector<2x4xf32>
    %98 = math.exp %45 : vector<2x1xf32>
    %99 = vector.broadcast %98 : vector<2x1xf32> to vector<2x4xf32>
    %100 = arith.mulf %99, %92 : vector<2x4xf32>
    %101 = math.exp %46 : vector<2x1xf32>
    %102 = vector.broadcast %101 : vector<2x1xf32> to vector<2x4xf32>
    %103 = arith.mulf %102, %97 : vector<2x4xf32>
    %104 = arith.addf %100, %103 : vector<2x4xf32>
    %105 = vector.broadcast %45 : vector<2x1xf32> to vector<2x4xf32>
    %106 = arith.addf %72, %105 : vector<2x4xf32>
    %107 = vector.broadcast %46 : vector<2x1xf32> to vector<2x4xf32>
    %108 = arith.addf %84, %107 : vector<2x4xf32>
    %109 = tpu.concatenate %106, %108 in 1 : vector<2x4xf32>, vector<2x4xf32> -> vector<2x8xf32>
    %cst_40 = arith.constant dense<0xFF800000> : vector<2xf32>
    %110 = vector.multi_reduction <maximumf>, %109, %cst_40 [1] : vector<2x8xf32> to vector<2xf32>
    %111 = vector.shape_cast %110 : vector<2xf32> to vector<2x1xf32>
    %112 = vector.broadcast %111 : vector<2x1xf32> to vector<2x8xf32>
    %113 = arith.subf %109, %112 : vector<2x8xf32>
    %114 = math.exp %113 : vector<2x8xf32>
    %cst_41 = arith.constant dense<0.000000e+00> : vector<2xf32>
    %115 = vector.multi_reduction <add>, %114, %cst_41 [1] : vector<2x8xf32> to vector<2xf32>
    %116 = vector.shape_cast %115 : vector<2xf32> to vector<2x1xf32>
    %117 = math.log %116 : vector<2x1xf32>
    %118 = arith.addf %111, %117 : vector<2x1xf32>
    %119 = vector.broadcast %118 : vector<2x1xf32> to vector<2x8xf32>
    %120 = arith.subf %109, %119 : vector<2x8xf32>
    %121 = tpu.concatenate %86, %87 in 1 : vector<2x4x4xf32>, vector<2x4x4xf32> -> vector<2x8x4xf32>
    %c0_42 = arith.constant 0 : index
    %c0_43 = arith.constant 0 : index
    %c0_44 = arith.constant 0 : index
    %122 = vector.load %arg14[%c0_42, %c0_43, %c0_44] : memref<2x8x4xf32, #tpu.memory_space<vmem>>, vector<2x8x4xf32>
    tpu.vector_store %arg14[%c0_42, %c0_43, %c0_44], %121 {strides = array<i32>} : memref<2x8x4xf32, #tpu.memory_space<vmem>>, vector<2x8x4xf32>,
    %cst_45 = arith.constant 0.000000e+00 : f32
    %123 = vector.broadcast %cst_45 : f32 to vector<2x108xf32>
    %124 = tpu.concatenate %104, %109, %120, %123 in 1 : vector<2x4xf32>, vector<2x8xf32>, vector<2x8xf32>, vector<2x108xf32> -> vector<2x128xf32>
    %c0_46 = arith.constant 0 : index
    %c0_47 = arith.constant 0 : index
    %125 = vector.load %arg13[%c0_46, %c0_47] : memref<2x128xf32, #tpu.memory_space<vmem>>, vector<2x128xf32>
    tpu.vector_store %arg13[%c0_46, %c0_47], %124 {strides = array<i32>} : memref<2x128xf32, #tpu.memory_space<vmem>>, vector<2x128xf32>,
    return
  }
}

</mosaic_0001>

<bundles_post_ra>
// kernel: tpu_custom_call.1
= control target key start
LH: loop header
LB: loop body
LE: loop exit
PB: predicated region body
PF: predicated region fallthrough
CT: control target
= control target key end

     0   :  { %20 = vsyncpa [#allocation3], 0  ;;  %s1504_s0 = inlined_call_operand.vmem [shape: f32[2,4,4], index: 0, kind: input, shape index: {}]   ;;  %s1505_s1 = inlined_call_operand.vmem [shape: f32[2,4], index: 1, kind: input, shape index: {}]   ;;  %s1506_s2 = inlined_call_operand.vmem [shape: f32[2,7], index: 2, kind: input, shape index: {}]   ;;  %s1507_s3 = inlined_call_operand.vmem [shape: f32[2,384], index: 3, kind: input, shape index: {}]   ;;  %s1508_s4 = inlined_call_operand.vmem [shape: f32[4,128], index: 4, kind: input, shape index: {}]   ;;  %s1509_s5 = inlined_call_operand.vmem [shape: f32[7,128], index: 5, kind: input, shape index: {}]   ;;  %s1510_s6 = inlined_call_operand.vmem [shape: f32[1,128], index: 6, kind: input, shape index: {}]   ;;  %s1511_s7 = inlined_call_operand.vmem [shape: f32[128,8], index: 7, kind: input, shape index: {}]   ;;  %s1512_s8 = inlined_call_operand.vmem [shape: f32[1,8], index: 8, kind: input, shape index: {}]   ;;  %s1513_s9 = inlined_call_operand.hbm [shape: f32[384,256], index: 9, kind: input, shape index: {}]   ;;  %s1514_s10 = inlined_call_operand.vmem [shape: f32[1,256], index: 10, kind: input, shape index: {}]   ;;  %s1515_s11 = inlined_call_operand.vmem [shape: f32[8,128], index: 11, kind: input, shape index: {}]   ;;  %s1516_s12 = inlined_call_operand.vmem [shape: f32[1,128], index: 12, kind: input, shape index: {}]   ;;  %s1517_s13 = inlined_call_operand.hbm [shape: f32[2,128], index: 13, kind: output, shape index: {0}]   ;;  %s1518_s14 = inlined_call_operand.vmem [shape: f32[2,8,4], index: 14, kind: output, shape index: {1}]  }
   0x1   :  { %21 = vsyncpa [#allocation4], 0  ;;  %s1208_s29 = smov [#allocation2]  }
   0x2   :  { %s45_s30 = sshll.u32 %s1208_s29, 4  ;;  %s46_s30 = int_to_ptr.vmem [resolvable:$true] %s45_s30 }
   0x3   :  { %s1172_s15 = scalar_lea.vmem %s46_s30, 12288  ;;  %p1177_p1 = scmp.lt.s32.totalorder %s46_s30, %s46_s30 }
   0x4   :  { %p1173_p0 = scmp.ne.s32.totalorder %s46_s30, %s1172_s15  ;;  %p1178_p2 = scmp.lt.s32.totalorder %s1172_s15, %s1172_s15 }
   0x6   :  { %p1179_p3 = por %p1178_p2, %p1177_p1 }
   0x8   :  { %p1180_p4 = pnand %p1179_p3, %p1173_p0 }
   0xa   :  { %1183 = shalt.err (!%p1180_p4)
}
   0xb   :  { %s1209_s16 = smov 256   ;;  %s1210_s17 = smov 16  }
   0xc   :  { %51 = dma.hbm_to_vmem [thread:$0]  %s1513_s9, 12288, %s46_s30, [#allocation3], %s1209_s16, %s1209_s16, %s1210_s17  }
   0xd   :  { %1204 = dma.done.wait [#allocation3], 12288  }
   0xe   :  { %1205 = vsyncadd [#allocation3], 4294955008  ;;  %v1211_v0 = vmov 0.0   ;;  %vm1212_vm0 = vmmov 0   ;;  %vm151_vm1 = vcmask 1046528   ;;  %vm71_vm2 = vcmask 1043456  }
   0xf   :  { %1068 = vmatprep.subr.mxu1 %v1211_v0  ;;  %1070 = vmatprep.mubr.msk.f32.mxu1 %vm1212_vm0, %v1211_v0  ;;  %vm147_vm3 = vcmask 56320   ;;  %vm68_vm4 = vcmask 31744   ;;  %v146_v1 = vld [vmem:[%s1509_s5] sm:$0x7f]  ;;  %v289_v5 = vld [vmem:[%s1511_s7 + $0x78] sm:$0xff]  ;;  %v288_v6 = vld [vmem:[%s1511_s7 + $0x70] sm:$0xff]  ;;  %v232_v51 = vlaneseq }
  0x10   :  { %1063 = vmatprep.subr.mxu0 %v1211_v0  ;;  %1065 = vmatprep.mubr.msk.f32.mxu0 %vm1212_vm0, %v1211_v0  ;;  %v145_v2 = vld [vmem:[%s1506_s2] sm:$0x3]  ;;  %v287_v7 = vld [vmem:[%s1511_s7 + $0x68] sm:$0xff]  ;;  %v285_v9 = vld [vmem:[%s1511_s7 + $0x58] sm:$0xff]  ;;  %s1213_s18 = smov 4   ;;  %vm671_vm5 = vcmask 64512  }
  0x11   :  { %v64_v3 = vld [vmem:[%s1508_s4] sm:$0xf]  ;;  %1069 = vmatpush3.msk.msra.mxu1 %vm151_vm1, %v146_v1  ;;  %v284_v10 = vld [vmem:[%s1511_s7 + $0x50] sm:$0xff]  ;;  %v283_v11 = vld [vmem:[%s1511_s7 + $0x48] sm:$0xff]  ;;  %v1214_v55 = vmov 1983009808  }
  0x12   :  { %1064 = vmatpush3.msk.msra.mxu0 %vm71_vm2, %v64_v3  ;;  %v1319_v4 = vld [vmem:[%s1504_s0] sm:$0xff]   ;;  %1071 = vmatmul.mubr.msk.f32.vlgmr.msra.gmra.mxu1 %vm147_vm3, %v145_v2  ;;  %v281_v13 = vld [vmem:[%s1511_s7 + $0x38] sm:$0xff]  ;;  %v280_v14 = vld [vmem:[%s1511_s7 + $0x30] sm:$0xff]  ;;  %v489_v56 = vunpack.c.l.s4 %v1214_v55  ;;  %v1392_v58 = vshrl.u32 %v232_v51, 7  ;;  %vm784_vm6 = vcmask 519168   ;;  %vm649_vm7 = vcmask 9216  }
  0x13   :  { %1073 = vmatprep.subr.mxu0 %v1211_v0  ;;  %1066 = vmatmul.mubr.msk.f32.vlgmr.msra.gmra.mxu0 %vm68_vm4, %v1319_v4  ;;  %v286_v8 = vld [vmem:[%s1511_s7 + $0x60] sm:$0xff]  ;;  %v279_v15 = vld [vmem:[%s1511_s7 + $0x28] sm:$0xff]  ;;  %v277_v17 = vld [vmem:[%s1511_s7 + $0x18] sm:$0xff]  ;;  %vm817_vm8 = vcmask 1041409   ;;  %vm821_vm9 = vcmask 25600   ;;  %vm972_vm10 = vcmask 58368  }
  0x14   :  { %1074 = vmatpush3.msra.mxu0 %v289_v5  ;;  %1105 = vmatprep.mubr.msk.f32.mxu0 %vm1212_vm0, %v1211_v0  ;;  %v282_v12 = vld [vmem:[%s1511_s7 + $0x40] sm:$0xff]  ;;  %v276_v18 = vld [vmem:[%s1511_s7 + $0x10] sm:$0xff]  ;;  %v275_v19 = vld [vmem:[%s1511_s7 + $0x8] sm:$0xff]  ;;  %v490_v61 = vunpack.c.0.s8 %v489_v56  ;;  %s1220_s27 = smov 12   ;;  %vm881_vm11 = vcmask 27648   ;;  %vm1007_vm12 = vcmask 97280  }
  0x15   :  { %1075 = vmatprep.subr.mxu0 %v1211_v0  ;;  %v278_v16 = vld [vmem:[%s1511_s7 + $0x20] sm:$0xff]  ;;  %v409_v21 = vld [vmem:[#allocation2 + $0xf8] sm:$0xff]  ;;  %v408_v22 = vld [vmem:[#allocation2 + $0xf0] sm:$0xff]  ;;  %372 = vrot.lane.b32.xlu0 %v1319_v4, %s1213_s18  ;;  %s1221_s2 = smov [#allocation5]   ;;  %vm1009_vm13 = vcmask 162816  }
  0x16   :  { %1076 = vmatpush3.msra.mxu0 %v288_v6  ;;  %v274_v20 = vld [vmem:[%s1511_s7] sm:$0xff]  ;;  %v407_v23 = vld [vmem:[#allocation2 + $0xe8] sm:$0xff]  ;;  %506 = vmatprep.subr.mxu1 %v409_v21  ;;  %v405_v25 = vld [vmem:[#allocation2 + $0xd8] sm:$0xff]  ;;  %v493_v2 = vsub.s32 %v490_v61, %v1392_v58  ;;  %s1018_s4 = sshll.u32 %s1221_s2, 4  ;;  %s1019_s4 = int_to_ptr.vmem [resolvable:$true] %s1018_s4 }
  0x17   :  { %1077 = vmatprep.subr.mxu0 %v1211_v0  ;;  %v406_v24 = vld [vmem:[#allocation2 + $0xe0] sm:$0xff]  ;;  %507 = vmatpush1.msra.mxu1 %v408_v22  ;;  %v404_v26 = vld [vmem:[#allocation2 + $0xd0] sm:$0xff]  ;;  %v403_v27 = vld [vmem:[#allocation2 + $0xc8] sm:$0xff]  ;;  %s1184_s0 = scalar_lea.vmem %s1019_s4, 32  ;;  %p1189_p6 = scmp.lt.s32.totalorder %s1019_s4, %s1019_s4 }
  0x18   :  { %1078 = vmatpush3.msra.mxu0 %v287_v7  ;;  %508 = vmatprep.subr.mxu1 %v407_v23  ;;  %v402_v28 = vld [vmem:[#allocation2 + $0xc0] sm:$0xff]  ;;  %v401_v29 = vld [vmem:[#allocation2 + $0xb8] sm:$0xff]  ;;  %v400_v30 = vld [vmem:[#allocation2 + $0xb0] sm:$0xff]  ;;  %p1185_p5 = scmp.ne.s32.totalorder %s1019_s4, %s1184_s0  ;;  %p1190_p7 = scmp.lt.s32.totalorder %s1184_s0, %s1184_s0 }
  0x19   :  { %1079 = vmatprep.subr.mxu0 %v1211_v0  ;;  %509 = vmatpush1.msra.mxu1 %v406_v24  ;;  %v399_v31 = vld [vmem:[#allocation2 + $0xa8] sm:$0xff]  ;;  %v398_v32 = vld [vmem:[#allocation2 + $0xa0] sm:$0xff]  ;;  %v397_v33 = vld [vmem:[#allocation2 + $0x98] sm:$0xff] }
  0x1a   :  { %1080 = vmatpush3.msra.mxu0 %v286_v8  ;;  %510 = vmatprep.subr.mxu1 %v405_v25  ;;  %v396_v34 = vld [vmem:[#allocation2 + $0x90] sm:$0xff]  ;;  %v473_v35 = vld [vmem:[#allocation2 + $0x2f8] sm:$0xff]  ;;  %v395_v36 = vld [vmem:[#allocation2 + $0x88] sm:$0xff]  ;;  %p1191_p8 = por %p1190_p7, %p1189_p6 }
  0x1b   :  { %1081 = vmatprep.subr.mxu0 %v1211_v0  ;;  %511 = vmatpush1.msra.mxu1 %v404_v26  ;;  %v394_v37 = vld [vmem:[#allocation2 + $0x80] sm:$0xff]  ;;  %v393_v38 = vld [vmem:[#allocation2 + $0x78] sm:$0xff]  ;;  %v392_v39 = vld [vmem:[#allocation2 + $0x70] sm:$0xff] }
  0x1c   :  { %1082 = vmatpush3.msra.mxu0 %v285_v9  ;;  %512 = vmatprep.subr.mxu1 %v403_v27  ;;  %v391_v40 = vld [vmem:[#allocation2 + $0x68] sm:$0xff]  ;;  %v390_v41 = vld [vmem:[#allocation2 + $0x60] sm:$0xff]  ;;  %v389_v42 = vld [vmem:[#allocation2 + $0x58] sm:$0xff]  ;;  %p1192_p9 = pnand %p1191_p8, %p1185_p5 }
  0x1d   :  { %1083 = vmatprep.subr.mxu0 %v1211_v0  ;;  %513 = vmatpush1.msra.mxu1 %v402_v28  ;;  %v388_v43 = vld [vmem:[#allocation2 + $0x50] sm:$0xff]  ;;  %v387_v44 = vld [vmem:[#allocation2 + $0x48] sm:$0xff]  ;;  %v386_v45 = vld [vmem:[#allocation2 + $0x40] sm:$0xff] }
  0x1e   :  { %1084 = vmatpush3.msra.mxu0 %v284_v10  ;;  %514 = vmatprep.subr.mxu1 %v401_v29  ;;  %v385_v46 = vld [vmem:[#allocation2 + $0x38] sm:$0xff]  ;;  %v384_v47 = vld [vmem:[#allocation2 + $0x30] sm:$0xff]  ;;  %v383_v48 = vld [vmem:[#allocation2 + $0x28] sm:$0xff] }
  0x1f   :  { %1085 = vmatprep.subr.mxu0 %v1211_v0  ;;  %515 = vmatpush1.msra.mxu1 %v400_v30  ;;  %v382_v49 = vld [vmem:[#allocation2 + $0x20] sm:$0xff]  ;;  %v381_v50 = vld [vmem:[#allocation2 + $0x18] sm:$0xff]  ;;  %v380_v52 = vld [vmem:[#allocation2 + $0x10] sm:$0xff] }
  0x20   :  { %1086 = vmatpush3.msra.mxu0 %v283_v11  ;;  %516 = vmatprep.subr.mxu1 %v399_v31  ;;  %v379_v53 = vld [vmem:[#allocation2 + $0x8] sm:$0xff]  ;;  %v378_v54 = vld [vmem:[#allocation2] sm:$0xff]  ;;  %v441_v57 = vld [vmem:[#allocation2 + $0x1f8] sm:$0xff] }
  0x21   :  { %1087 = vmatprep.subr.mxu0 %v1211_v0  ;;  %517 = vmatpush1.msra.mxu1 %v398_v32  ;;  %v440_v59 = vld [vmem:[#allocation2 + $0x1f0] sm:$0xff]  ;;  %v377_v60 = vld [vmem:[%s1507_s3] sm:$0x3f]  ;;  %v439_v62 = vld [vmem:[#allocation2 + $0x1e8] sm:$0xff] }
  0x22   :  { %1088 = vmatpush3.msra.mxu0 %v282_v12  ;;  %518 = vmatprep.subr.mxu1 %v397_v33  ;;  %v487_v63 = vcombine.high %v377_v60, %v377_v60  ;;  %v438_v1 = vld [vmem:[#allocation2 + $0x1e0] sm:$0xff]  ;;  %v437_v3 = vld [vmem:[#allocation2 + $0x1d8] sm:$0xff]  ;;  %v436_v5 = vld [vmem:[#allocation2 + $0x1d0] sm:$0xff]  ;;  %v494_v6 = vrot.slane %v377_v60, %v493_v2 }
  0x23   :  { %1089 = vmatprep.subr.mxu0 %v1211_v0  ;;  %519 = vmatpush1.msra.mxu1 %v396_v34  ;;  %v435_v8 = vld [vmem:[#allocation2 + $0x1c8] sm:$0xff]  ;;  %v434_v9 = vld [vmem:[#allocation2 + $0x1c0] sm:$0xff]  ;;  %v433_v11 = vld [vmem:[#allocation2 + $0x1b8] sm:$0xff] }
  0x24   :  { %1090 = vmatpush3.msra.mxu0 %v281_v13  ;;  %520 = vmatprep.subr.mxu1 %v395_v36  ;;  %v1398_v7 = vrot.slane %v487_v63, %v493_v2  ;;  %v502_v10 = vcombine.high %v494_v6, %v494_v6  ;;  %v432_v12 = vld [vmem:[#allocation2 + $0x1b0] sm:$0xff]  ;;  %v431_v13 = vld [vmem:[#allocation2 + $0x1a8] sm:$0xff]  ;;  %v422_v22 = vld [vmem:[#allocation2 + $0x160] sm:$0xff] }
  0x25   :  { %1091 = vmatprep.subr.mxu0 %v1211_v0  ;;  %521 = vmatpush1.msra.mxu1 %v394_v37  ;;  %v423_v21 = vld [vmem:[#allocation2 + $0x168] sm:$0xff]  ;;  %v421_v23 = vld [vmem:[#allocation2 + $0x158] sm:$0xff]  ;;  %v420_v24 = vld [vmem:[#allocation2 + $0x150] sm:$0xff] }
  0x26   :  { %1092 = vmatpush3.msra.mxu0 %v280_v14  ;;  %522 = vmatprep.subr.mxu1 %v393_v38  ;;  %v430_v14 = vld [vmem:[#allocation2 + $0x1a0] sm:$0xff]  ;;  %v419_v25 = vld [vmem:[#allocation2 + $0x148] sm:$0xff]  ;;  %v417_v27 = vld [vmem:[#allocation2 + $0x138] sm:$0xff] }
  0x27   :  { %1093 = vmatprep.subr.mxu0 %v1211_v0  ;;  %523 = vmatpush1.msra.mxu1 %v392_v39  ;;  %v418_v26 = vld [vmem:[#allocation2 + $0x140] sm:$0xff]  ;;  %v416_v28 = vld [vmem:[#allocation2 + $0x130] sm:$0xff]  ;;  %v415_v29 = vld [vmem:[#allocation2 + $0x128] sm:$0xff] }
  0x28   :  { %1094 = vmatpush3.msra.mxu0 %v279_v15  ;;  %524 = vmatprep.subr.mxu1 %v391_v40  ;;  %v429_v15 = vld [vmem:[#allocation2 + $0x198] sm:$0xff]  ;;  %v414_v30 = vld [vmem:[#allocation2 + $0x120] sm:$0xff]  ;;  %v412_v32 = vld [vmem:[#allocation2 + $0x110] sm:$0xff] }
  0x29   :  { %1095 = vmatprep.subr.mxu0 %v1211_v0  ;;  %525 = vmatpush1.msra.mxu1 %v390_v41  ;;  %v413_v31 = vld [vmem:[#allocation2 + $0x118] sm:$0xff]  ;;  %v411_v33 = vld [vmem:[#allocation2 + $0x108] sm:$0xff]  ;;  %v410_v34 = vld [vmem:[#allocation2 + $0x100] sm:$0xff] }
  0x2a   :  { %1096 = vmatpush3.msra.mxu0 %v278_v16  ;;  %526 = vmatprep.subr.mxu1 %v389_v42  ;;  %v428_v16 = vld [vmem:[#allocation2 + $0x190] sm:$0xff]  ;;  %v1405_v42 = vsub.s32 0, %v1392_v58  ;;  %v470_v63 = vld [vmem:[#allocation2 + $0x2e0] sm:$0xff] }
  0x2b   :  { %1097 = vmatprep.subr.mxu0 %v1211_v0  ;;  %527 = vmatpush1.msra.mxu1 %v388_v43  ;;  %v472_v61 = vld [vmem:[#allocation2 + $0x2f0] sm:$0xff] }
  0x2c   :  { %1098 = vmatpush3.msra.mxu0 %v277_v17  ;;  %528 = vmatprep.subr.mxu1 %v387_v44  ;;  %v427_v17 = vld [vmem:[#allocation2 + $0x188] sm:$0xff]  ;;  %v468_v2 = vld [vmem:[#allocation2 + $0x2d0] sm:$0xff] }
  0x2d   :  { %1099 = vmatprep.subr.mxu0 %v1211_v0  ;;  %529 = vmatpush1.msra.mxu1 %v386_v45 }
  0x2e   :  { %1100 = vmatpush3.msra.mxu0 %v276_v18  ;;  %530 = vmatprep.subr.mxu1 %v385_v46  ;;  %v426_v18 = vld [vmem:[#allocation2 + $0x180] sm:$0xff] }
  0x2f   :  { %1101 = vmatprep.subr.mxu0 %v1211_v0  ;;  %531 = vmatpush1.msra.mxu1 %v384_v47 }
  0x30   :  { %1102 = vmatpush3.msra.mxu0 %v275_v19  ;;  %532 = vmatprep.subr.mxu1 %v383_v48  ;;  %v425_v19 = vld [vmem:[#allocation2 + $0x178] sm:$0xff] }
  0x31   :  { %1103 = vmatprep.subr.mxu0 %v1211_v0  ;;  %533 = vmatpush1.msra.mxu1 %v382_v49 }
  0x32   :  { %1104 = vmatpush3.msra.mxu0 %v274_v20  ;;  %534 = vmatprep.subr.mxu1 %v381_v50  ;;  %v424_v20 = vld [vmem:[#allocation2 + $0x170] sm:$0xff]  ;;  %v1035_v50 = vld [vmem:[%s1510_s6] ss:$0 sm:$0xff] }
  0x33   :  { %577 = vmatprep.subr.mxu0 %v473_v35  ;;  %535 = vmatpush1.msra.mxu1 %v380_v52  ;;  %v1215_v35 = vmov 1966171168  }
  0x34   :  { %536 = vmatprep.subr.mxu1 %v379_v53  ;;  %570 = vmatprep.mubr.f32.mxu1 %v502_v10  ;;  %v230_v36 = vunpack.c.l.s4 %v1215_v35  ;;  %v462_v10 = vld [vmem:[#allocation2 + $0x2a0] sm:$0xff] }
  0x35   :  { %537 = vmatpush1.msra.mxu1 %v378_v54 }
  0x36   :  { %538 = vmatprep.subr.mxu1 %v441_v57  ;;  %v231_v37 = vunpack.c.0.s8 %v230_v36 }
  0x37   :  { %539 = vmatpush2.msra.mxu1 %v440_v59 }
  0x38   :  { %540 = vmatprep.subr.mxu1 %v439_v62  ;;  %v1401_v38 = vsub.s32 %v231_v37, %v1392_v58  ;;  %v471_v62 = vld [vmem:[#allocation2 + $0x2e8] sm:$0xff] }
  0x39   :  { %541 = vmatpush2.msra.mxu1 %v438_v1  ;;  %v469_v1 = vld [vmem:[#allocation2 + $0x2d8] sm:$0xff] }
  0x3a   :  { %542 = vmatprep.subr.mxu1 %v437_v3  ;;  %v467_v3 = vld [vmem:[#allocation2 + $0x2c8] sm:$0xff] }
  0x3b   :  { %543 = vmatpush2.msra.mxu1 %v436_v5  ;;  %v466_v5 = vld [vmem:[#allocation2 + $0x2c0] sm:$0xff] }
  0x3c   :  { %544 = vmatprep.subr.mxu1 %v435_v8  ;;  %v464_v8 = vld [vmem:[#allocation2 + $0x2b0] sm:$0xff] }
  0x3d   :  { %545 = vmatpush2.msra.mxu1 %v434_v9  ;;  %v463_v9 = vld [vmem:[#allocation2 + $0x2a8] sm:$0xff] }
  0x3e   :  { %546 = vmatprep.subr.mxu1 %v433_v11  ;;  %v461_v11 = vld [vmem:[#allocation2 + $0x298] sm:$0xff] }
  0x3f   :  { %547 = vmatpush2.msra.mxu1 %v432_v12  ;;  %v460_v12 = vld [vmem:[#allocation2 + $0x290] sm:$0xff] }
  0x40   :  { %548 = vmatprep.subr.mxu1 %v431_v13  ;;  %v459_v13 = vld [vmem:[#allocation2 + $0x288] sm:$0xff] }
  0x41   :  { %549 = vmatpush2.msra.mxu1 %v430_v14  ;;  %v458_v14 = vld [vmem:[#allocation2 + $0x280] sm:$0xff] }
  0x42   :  { %550 = vmatprep.subr.mxu1 %v429_v15  ;;  %v457_v15 = vld [vmem:[#allocation2 + $0x278] sm:$0xff] }
  0x43   :  { %551 = vmatpush2.msra.mxu1 %v428_v16  ;;  %v456_v16 = vld [vmem:[#allocation2 + $0x270] sm:$0xff] }
  0x44   :  { %552 = vmatprep.subr.mxu1 %v427_v17  ;;  %v455_v17 = vld [vmem:[#allocation2 + $0x268] sm:$0xff] }
  0x45   :  { %553 = vmatpush2.msra.mxu1 %v426_v18  ;;  %v454_v18 = vld [vmem:[#allocation2 + $0x260] sm:$0xff] }
  0x46   :  { %554 = vmatprep.subr.mxu1 %v425_v19  ;;  %v453_v19 = vld [vmem:[#allocation2 + $0x258] sm:$0xff] }
  0x47   :  { %555 = vmatpush2.msra.mxu1 %v424_v20  ;;  %v452_v20 = vld [vmem:[#allocation2 + $0x250] sm:$0xff] }
  0x48   :  { %556 = vmatprep.subr.mxu1 %v423_v21  ;;  %v451_v21 = vld [vmem:[#allocation2 + $0x248] sm:$0xff] }
  0x49   :  { %557 = vmatpush2.msra.mxu1 %v422_v22  ;;  %v450_v22 = vld [vmem:[#allocation2 + $0x240] sm:$0xff] }
  0x4a   :  { %558 = vmatprep.subr.mxu1 %v421_v23  ;;  %v449_v23 = vld [vmem:[#allocation2 + $0x238] sm:$0xff] }
  0x4b   :  { %559 = vmatpush2.msra.mxu1 %v420_v24  ;;  %v448_v24 = vld [vmem:[#allocation2 + $0x230] sm:$0xff] }
  0x4c   :  { %560 = vmatprep.subr.mxu1 %v419_v25  ;;  %v447_v25 = vld [vmem:[#allocation2 + $0x228] sm:$0xff] }
  0x4d   :  { %561 = vmatpush2.msra.mxu1 %v418_v26  ;;  %v446_v26 = vld [vmem:[#allocation2 + $0x220] sm:$0xff] }
  0x4e   :  { %562 = vmatprep.subr.mxu1 %v417_v27  ;;  %v445_v27 = vld [vmem:[#allocation2 + $0x218] sm:$0xff] }
  0x4f   :  { %563 = vmatpush2.msra.mxu1 %v416_v28  ;;  %v444_v28 = vld [vmem:[#allocation2 + $0x210] sm:$0xff] }
  0x50   :  { %564 = vmatprep.subr.mxu1 %v415_v29  ;;  %v443_v29 = vld [vmem:[#allocation2 + $0x208] sm:$0xff] }
  0x51   :  { %565 = vmatpush2.msra.mxu1 %v414_v30  ;;  %v442_v30 = vld [vmem:[#allocation2 + $0x200] sm:$0xff] }
  0x52   :  { %566 = vmatprep.subr.mxu1 %v413_v31  ;;  %v663_v31 = vld [vmem:[%s1515_s11] sm:$0xff] }
  0x53   :  { %567 = vmatpush2.msra.mxu1 %v412_v32 }
  0x54   :  { %568 = vmatprep.subr.mxu1 %v411_v33  ;;  %v1036_v33 = vld [vmem:[%s1512_s8] ss:$0 sm:$0xff] }
  0x55   :  { %569 = vmatpush2.msra.mxu1 %v410_v34 }
  0x56   :  { %571 = vmatmul.mubr.f32.vlgmr.msra.gmra.mxu1 %v494_v6  ;;  %v465_v6 = vld [vmem:[#allocation2 + $0x2b8] sm:$0xff] }
  0x87   :  { %v373_v32 = vpop.permute.xlu0 %372 }
  0x88   :  { %v375_v35 = vsel %vm68_vm4, %v1319_v4, %v373_v32  ;;  %v1037_v4 = vld [vmem:[%s1516_s12] ss:$0 sm:$0xff]  ;;  %v1217_v32 = vmov 1  }
  0x89   :  { %1127 = vset.pattern.permute.xlu1 %v1217_v32 }
  0xd2   :  { %v221_v39 = vpop.f32.mrf.mxu1 }
  0xd3   :  { %v235_v40 = vrot.slane %v221_v39, %v1401_v38  ;;  %v141_v41 = vpop.f32.mrf.mxu0 }
  0xd4   :  { %v1072_v43 = vpop.f32.mrf.mxu1  ;;  %v226_v48 = vcombine.high %v141_v41, %v141_v41 }
  0xd5   :  { %v236_v44 = vcombine.high %v235_v40, %v235_v40  ;;  %v243_v45 = vrot.slane %v235_v40, %v1401_v38  ;;  %v1067_v46 = vpop.f32.mrf.mxu0 }
  0xd7   :  { %v250_v47 = vrot.slane %v236_v44, %v1401_v38  ;;  %v254_v49 = vrot.slane %v243_v45, %v1405_v42 }
  0xd9   :  { %v258_v52 = vrot.slane %v250_v47, %v1405_v42  ;;  %v261_v53 = vadd.f32 %v254_v49, %v141_v41 }
  0xdb   :  { %v262_v54 = vadd.f32 %v258_v52, %v226_v48  ;;  %v270_v55 = vadd.f32 %v1035_v50, %v261_v53 }
  0xdd   :  { %v271_v56 = vadd.f32 %v1035_v50, %v262_v54  ;;  %1134 = vtanh.f32 %v270_v55 }
  0xdf   :  { %1136 = vtanh.f32 %v271_v56 }
  0xea   :  { %v1135_v57 = vpop.eup %1134 }
  0xec   :  { %v1137_v59 = vpop.eup %1136 }
  0xed   :  { %v299_v60 = vcombine.low %v1135_v57, %v1137_v59 }
  0xef   :  { %1106 = vmatmul.mubr.f32.vlgmr.msra.gmra.mxu0 %v299_v60 }
  0xf0   :  { %578 = vmatpush1.msra.mxu0 %v472_v61  ;;  %641 = vmatprep.mubr.f32.mxu0 %v1211_v0 }
  0xf1   :  { %579 = vmatprep.subr.mxu0 %v471_v62  ;;  %v1443_v62 = vsub.s32 1, %v1392_v58 }
  0xf2   :  { %580 = vmatpush1.msra.mxu0 %v470_v63 }
  0xf3   :  { %581 = vmatprep.subr.mxu0 %v469_v1 }
  0xf4   :  { %582 = vmatpush1.msra.mxu0 %v468_v2 }
  0xf5   :  { %583 = vmatprep.subr.mxu0 %v467_v3 }
  0xf6   :  { %584 = vmatpush1.msra.mxu0 %v466_v5 }
  0xf7   :  { %585 = vmatprep.subr.mxu0 %v465_v6 }
  0xf8   :  { %586 = vmatpush1.msra.mxu0 %v464_v8 }
  0xf9   :  { %587 = vmatprep.subr.mxu0 %v463_v9 }
  0xfa   :  { %588 = vmatpush1.msra.mxu0 %v462_v10 }
  0xfb   :  { %589 = vmatprep.subr.mxu0 %v461_v11 }
  0xfc   :  { %590 = vmatpush1.msra.mxu0 %v460_v12  ;;  %v808_v12 = vand.u32 127, %v232_v51 }
  0xfd   :  { %591 = vmatprep.subr.mxu0 %v459_v13 }
  0xfe   :  { %592 = vmatpush1.msra.mxu0 %v458_v14  ;;  %v811_v13 = vsub.s32 %v808_v12, %v1392_v58 }
  0xff   :  { %593 = vmatprep.subr.mxu0 %v457_v15 }
 0x100   :  { %594 = vmatpush1.msra.mxu0 %v456_v16 }
 0x101   :  { %595 = vmatprep.subr.mxu0 %v455_v17 }
 0x102   :  { %596 = vmatpush1.msra.mxu0 %v454_v18  ;;  %v63_v18 = vld [vmem:[%s1505_s1] sm:$0x3]  ;;  %s1219_s1 = smov 124  }
 0x103   :  { %597 = vmatprep.subr.mxu0 %v453_v19 }
 0x104   :  { %598 = vmatpush1.msra.mxu0 %v452_v20 }
 0x105   :  { %599 = vmatprep.subr.mxu0 %v451_v21 }
 0x106   :  { %600 = vmatpush1.msra.mxu0 %v450_v22 }
 0x107   :  { %601 = vmatprep.subr.mxu0 %v449_v23 }
 0x108   :  { %602 = vmatpush1.msra.mxu0 %v448_v24 }
 0x109   :  { %603 = vmatprep.subr.mxu0 %v447_v25 }
 0x10a   :  { %604 = vmatpush1.msra.mxu0 %v446_v26 }
 0x10b   :  { %605 = vmatprep.subr.mxu0 %v445_v27 }
 0x10c   :  { %606 = vmatpush1.msra.mxu0 %v444_v28 }
 0x10d   :  { %607 = vmatprep.subr.mxu0 %v443_v29 }
 0x10e   :  { %608 = vmatpush1.msra.mxu0 %v442_v30 }
 0x10f   :  { %642 = vmatmul.mubr.f32.vlgmr.msra.gmra.mxu0 %v1398_v7  ;;  %1108 = vmatprep.subr.mxu0 %v1211_v0 }
 0x110   :  { %1110 = vmatprep.mubr.msk.f32.mxu0 %vm1212_vm0, %v1211_v0  ;;  %1109 = vmatpush3.msra.mxu0 %v663_v31  ;;  %v474_v0 = vld [vmem:[%s1514_s10] sm:$0x3]  ;;  %s1216_s10 = smov 64  }
 0x111   :  { %v479_v39 = vrot.slane %v474_v0, %v1405_v42  ;;  %v483_v63 = vrot.slane %v474_v0, %v1443_v62 }
 0x116   :  { %v572_v40 = vpop.f32.mrf.mxu1 }
 0x117   :  { %v573_v41 = vadd.f32 %v572_v40, %v479_v39 }
 0x118   :  { %v574_v1 = vpop.f32.mrf.mxu1 }
 0x119   :  { %v575_v2 = vadd.f32 %v574_v1, %v483_v63 }
 0x1af   :  { %v367_v34 = vpop.f32.mrf.mxu0 }
 0x1b0   :  { %v368_v7 = vadd.f32 %v1036_v33, %v367_v34  ;;  %v1218_v33 = vmov 0  }
 0x1b1   :  { %v1107_v36 = vpop.f32.mrf.mxu0  ;;  %1128 = vset.pattern.permute.xlu0 %v1218_v33 }
 0x1b2   :  { %v1427_v37 = vadd.f32 %v375_v35, %v368_v7 }
 0x1b4   :  { %1111 = vmatmul.mubr.msk.f32.vlgmr.msra.gmra.mxu0 %vm671_vm5, %v1427_v37 }
 0x1cf   :  { %v643_v43 = vpop.f32.mrf.mxu0 }
 0x1d0   :  { %v644_v44 = vadd.f32 %v643_v43, %v573_v41 }
 0x1d1   :  { %v645_v45 = vpop.f32.mrf.mxu0 }
 0x1d2   :  { %1138 = vtanh.f32 %v644_v44  ;;  %v646_v6 = vadd.f32 %v645_v45, %v575_v2 }
 0x1d4   :  { %v650_v10 = vsel %vm649_vm7, %v646_v6, -inf }
 0x1df   :  { %v1139_v46 = vpop.eup %1138 }
 0x1e0   :  { %v756_v50 = vrot.slane %v1139_v46, %v1401_v38 }
 0x1e2   :  { %v757_v52 = vcombine.high %v756_v50, %v756_v50  ;;  %v764_v53 = vrot.slane %v756_v50, %v1401_v38 }
 0x1e4   :  { %v771_v54 = vrot.slane %v757_v52, %v1401_v38  ;;  %v775_v55 = vrot.slane %v764_v53, %v1405_v42 }
 0x1e6   :  { %v779_v56 = vrot.slane %v771_v54, %v1405_v42 }
 0x274   :  { %v741_v47 = vpop.f32.mrf.mxu0 }
 0x275   :  { %v742_v48 = vadd.f32 %v1037_v4, %v741_v47 }
 0x276   :  { %v1112_v49 = vpop.f32.mrf.mxu0 }
 0x277   :  { %1140 = vtanh.f32 %v742_v48 }
 0x284   :  { %v1141_v57 = vpop.eup %1140 }
 0x285   :  { %v782_v59 = vmul.f32 %v1141_v57, %v775_v55  ;;  %v747_v60 = vcombine.high %v1141_v57, %v1141_v57 }
 0x287   :  { %793 = vrot.lane.b32.xlu0 %v782_v59, %s1216_s10  ;;  %v783_v61 = vmul.f32 %v779_v56, %v747_v60  ;;  %v785_v9 = vsel %vm784_vm6, %v782_v59, 0.0 }
 0x289   :  { %795 = vrot.lane.b32.xlu1 %v783_v61, %s1216_s10  ;;  %v788_v11 = vsel %vm784_vm6, %v783_v61, 0.0 }
 0x2f9   :  { %v794_v3 = vpop.permute.xlu0 %793 }
 0x2fa   :  { %v799_v38 = vsel %vm784_vm6, %v794_v3, 0.0 }
 0x2fb   :  { %800 = vadd.xlane.f32.xlu1 %v799_v38  ;;  %v796_v5 = vpop.permute.xlu1 %795 }
 0x2fc   :  { %v802_v8 = vsel %vm784_vm6, %v796_v5, 0.0 }
 0x2fd   :  { %803 = vadd.xlane.f32.xlu0 %v802_v8 }
 0x2ff   :  { %786 = vadd.xlane.f32.xlu1 %v785_v9 }
 0x301   :  { %651 = vmax.xlane.f32.xlu0 %v650_v10 }
 0x305   :  { %789 = vadd.xlane.f32.xlu0 %v788_v11 }
 0x384   :  { %v801_v14 = vpop.xlane.xlu1 %800 }
 0x385   :  { %v840_v16 = vrot.slane %v801_v14, %v811_v13 }
 0x386   :  { %v804_v15 = vpop.xlane.xlu0 %803 }
 0x387   :  { %v844_v17 = vrot.slane %v804_v15, %v811_v13  ;;  %v1471_v15 = vcombine.high %v1427_v37, %v1427_v37 }
 0x388   :  { %v787_v23 = vpop.xlane.xlu1 %786 }
 0x389   :  { %v845_v19 = vsel %vm817_vm8, %v844_v17, %v840_v16  ;;  %v812_v25 = vrot.slane %v787_v23, %v811_v13 }
 0x38a   :  { %v652_v20 = vpop.xlane.xlu0 %651  ;;  %v847_v21 = vadd.f32 %v845_v19, %v63_v18 }
 0x38b   :  { %v653_v22 = vsub.f32 %v646_v6, %v652_v20 }
 0x38c   :  { %v848_v51 = vsel %vm821_vm9, %v847_v21, -inf }
 0x38d   :  { %v654_v24 = vmul.f32 1.442695, %v653_v22  ;;  %849 = vmax.xlane.f32.xlu1 %v848_v51  ;;  %v986_v22 = vcombine.low %v1427_v37, %v1427_v37 }
 0x38e   :  { %v790_v58 = vpop.xlane.xlu0 %789 }
 0x38f   :  { %1142 = vpow2.f32 %v654_v24  ;;  %v816_v26 = vrot.slane %v790_v58, %v811_v13 }
 0x391   :  { %v818_v27 = vsel %vm817_vm8, %v816_v26, %v812_v25 }
 0x392   :  { %v820_v28 = vadd.f32 %v818_v27, %v63_v18 }
 0x394   :  { %v822_v29 = vsel %vm821_vm9, %v820_v28, -inf }
 0x395   :  { %823 = vmax.xlane.f32.xlu1 %v822_v29 }
 0x39c   :  { %v1143_v30 = vpop.eup %1142 }
 0x39d   :  { %v656_v31 = vsel %vm649_vm7, %v1143_v30, 0.0 }
 0x39e   :  { %657 = vadd.xlane.f32.xlu0 %v656_v31 }
 0x416   :  { %v850_v34 = vpop.xlane.xlu1 %849 }
 0x417   :  { %v851_v35 = vsub.f32 %v847_v21, %v850_v34 }
 0x419   :  { %v852_v7 = vmul.f32 1.442695, %v851_v35 }
 0x41b   :  { %1144 = vpow2.f32 %v852_v7 }
 0x41e   :  { %v824_v36 = vpop.xlane.xlu1 %823 }
 0x41f   :  { %v825_v0 = vsub.f32 %v820_v28, %v824_v36 }
 0x421   :  { %v826_v39 = vmul.f32 1.442695, %v825_v0 }
 0x423   :  { %1146 = vpow2.f32 %v826_v39 }
 0x427   :  { %v658_v40 = vpop.xlane.xlu0 %657 }
 0x428   :  { %v1145_v41 = vpop.eup %1144  ;;  %1148 = vlog2.f32 %v658_v40 }
 0x429   :  { %v854_v43 = vsel %vm821_vm9, %v1145_v41, 0.0 }
 0x42a   :  { %855 = vadd.xlane.f32.xlu0 %v854_v43 }
 0x430   :  { %v1147_v44 = vpop.eup %1146 }
 0x431   :  { %v828_v45 = vsel %vm821_vm9, %v1147_v44, 0.0 }
 0x432   :  { %829 = vadd.xlane.f32.xlu0 %v828_v45 }
 0x435   :  { %v1149_v4 = vpop.eup %1148 }
 0x436   :  { %v660_v46 = vmul.f32 0.6931472, %v1149_v4 }
 0x438   :  { %v661_v47 = vadd.f32 %v660_v46, %v652_v20 }
 0x43a   :  { %v662_v48 = vsub.f32 %v646_v6, %v661_v47 }
 0x43c   :  { %963 = vperm.xlu1 %1127, %v662_v48   ;;  %v934_v11 = vmul.f32 1.442695, %v662_v48 }
 0x440   :  { %1129 = vset.pattern.permute.xlu1 %v1218_v33 }
 0x448   :  { %958 = vperm.xlu0 %1128, %v662_v48  }
 0x44c   :  { %1131 = vset.pattern.permute.xlu0 %v1217_v32 }
 0x4b3   :  { %v856_v49 = vpop.xlane.xlu0 %855 }
 0x4b4   :  { %1150 = vlog2.f32 %v856_v49 }
 0x4b7   :  { %v964_v55 = vpop.permute.xlu1 %963 }
 0x4bb   :  { %v830_v57 = vpop.xlane.xlu0 %829 }
 0x4bc   :  { %1152 = vlog2.f32 %v830_v57 }
 0x4c1   :  { %v1151_v50 = vpop.eup %1150 }
 0x4c2   :  { %v858_v52 = vmul.f32 0.6931472, %v1151_v50 }
 0x4c3   :  { %v959_v2 = vpop.permute.xlu0 %958 }
 0x4c4   :  { %v859_v53 = vadd.f32 %v858_v52, %v850_v34 }
 0x4c6   :  { %v860_v54 = vsub.f32 %v847_v21, %v859_v53 }
 0x4c8   :  { %v966_v56 = vadd.f32 %v964_v55, %v860_v54  ;;  %v896_v8 = vmul.f32 1.442695, %v860_v54 }
 0x4c9   :  { %v1153_v59 = vpop.eup %1152 }
 0x4ca   :  { %968 = vrot.lane.b32.xlu1 %v966_v56, %s1213_s18  ;;  %v832_v60 = vmul.f32 0.6931472, %v1153_v59 }
 0x4cc   :  { %v833_v61 = vadd.f32 %v832_v60, %v824_v36 }
 0x4ce   :  { %v834_v63 = vsub.f32 %v820_v28, %v833_v61 }
 0x4d0   :  { %v863_v1 = vmul.f32 1.442695, %v834_v63  ;;  %v961_v3 = vadd.f32 %v959_v2, %v834_v63 }
 0x4d2   :  { %1154 = vpow2.f32 %v863_v1 }
 0x4d3   :  { %1156 = vpow2.f32 %v896_v8 }
 0x4d4   :  { %1158 = vpow2.f32 %v934_v11 }
 0x4df   :  { %v1155_v9 = vpop.eup %1154 }
 0x4e0   :  { %v868_v10 = vrot.slane %v1155_v9, %v1405_v42  ;;  %v875_v12 = vrot.slane %v1155_v9, %v1443_v62  ;;  %v1157_v13 = vpop.eup %1156 }
 0x4e1   :  { %v901_v14 = vrot.slane %v1157_v13, %v1405_v42  ;;  %v1159_v16 = vpop.eup %1158  ;;  %v908_v21 = vrot.slane %v1157_v13, %v1443_v62 }
 0x53c   :  { %v969_v38 = vpop.permute.xlu1 %968 }
 0x53d   :  { %v971_v5 = vsel %vm68_vm4, %v961_v3, %v969_v38 }
 0x53e   :  { %v973_v6 = vsel %vm972_vm10, %v971_v5, -inf }
 0x53f   :  { %974 = vmax.xlane.f32.xlu1 %v973_v6 }
 0x550   :  { %870 = vbcast.lane.b32.xlu1 %v868_v10, 256 }
 0x554   :  { %877 = vbcast.lane.b32.xlu1 %v875_v12, 256 }
 0x558   :  { %903 = vbcast.lane.b32.xlu1 %v901_v14, 256 }
 0x55c   :  { %912 = vrot.lane.b32.xlu1 %v1427_v37, %s1219_s1 }
 0x560   :  { %914 = vrot.lane.b32.xlu1 %v1471_v15, %s1219_s1 }
 0x564   :  { %938 = vperm.xlu1 %1129, %v1159_v16  }
 0x568   :  { %1130 = vset.pattern.permute.xlu1 %v1217_v32 }
 0x569   :  { %947 = vperm.xlu1 %1130, %v1159_v16  }
 0x56d   :  { %999 = vrot.lane.b32.xlu1 %v971_v5, %s1213_s18 }
 0x5c8   :  { %v975_v42 = vpop.xlane.xlu1 %974 }
 0x5c9   :  { %v976_v17 = vsub.f32 %v971_v5, %v975_v42 }
 0x5cb   :  { %v977_v18 = vmul.f32 1.442695, %v976_v17 }
 0x5cc   :  { %v871_v28 = vpop.permute.xlu1 %870 }
 0x5cd   :  { %1160 = vpow2.f32 %v977_v18  ;;  %v879_v7 = vmul.f32 %v871_v28, %v1427_v37 }
 0x5cf   :  { %v882_v41 = vsel %vm881_vm11, %v879_v7, 0.0 }
 0x5d0   :  { %v878_v29 = vpop.permute.xlu1 %877  ;;  %v883_v45 = vrot.slane %v882_v41, 4 }
 0x5d1   :  { %v880_v34 = vmul.f32 %v878_v29, %v1471_v15 }
 0x5d2   :  { %v884_v48 = vadd.f32 %v883_v45, %v882_v41 }
 0x5d3   :  { %v889_v0 = vsel %vm881_vm11, %v880_v34, 0.0 }
 0x5d4   :  { %v904_v30 = vpop.permute.xlu1 %903  ;;  %v890_v43 = vrot.slane %v889_v0, 4  ;;  %v885_v53 = vrot.slane %v884_v48, 2 }
 0x5d6   :  { %v891_v46 = vadd.f32 %v890_v43, %v889_v0 }
 0x5d8   :  { %v913_v31 = vpop.permute.xlu1 %912  ;;  %v892_v50 = vrot.slane %v891_v46, 2 }
 0x5d9   :  { %v918_v35 = vmul.f32 %v913_v31, %v904_v30 }
 0x5da   :  { %v1161_v19 = vpop.eup %1160  ;;  %v893_v55 = vadd.f32 %v892_v50, %v891_v46 }
 0x5db   :  { %v979_v20 = vsel %vm972_vm10, %v1161_v19, 0.0  ;;  %v920_v39 = vsel %vm881_vm11, %v918_v35, 0.0 }
 0x5dc   :  { %980 = vadd.xlane.f32.xlu0 %v979_v20  ;;  %v915_v32 = vpop.permute.xlu1 %914  ;;  %v921_v44 = vrot.slane %v920_v39, 4  ;;  %v894_v59 = vrot.slane %v893_v55, 1 }
 0x5de   :  { %v922_v47 = vadd.f32 %v921_v44, %v920_v39  ;;  %v895_v3 = vadd.f32 %v894_v59, %v893_v55 }
 0x5e0   :  { %v923_v52 = vrot.slane %v922_v47, 2  ;;  %v939_v61 = vpop.permute.xlu1 %938 }
 0x5e2   :  { %v924_v56 = vadd.f32 %v923_v52, %v922_v47 }
 0x5e4   :  { %v925_v60 = vrot.slane %v924_v56, 1  ;;  %v948_v6 = vpop.permute.xlu1 %947 }
 0x5e6   :  { %v926_v2 = vadd.f32 %v925_v60, %v924_v56 }
 0x5e8   :  { %v1000_v11 = vpop.permute.xlu1 %999 }
 0x5f2   :  { %910 = vbcast.lane.b32.xlu0 %v908_v21, 256 }
 0x5f6   :  { %988 = vrot.lane.b32.xlu0 %v986_v22, %s1219_s1 }
 0x665   :  { %v981_v23 = vpop.xlane.xlu0 %980 }
 0x666   :  { %1162 = vlog2.f32 %v981_v23 }
 0x669   :  { %v911_v51 = vpop.permute.xlu0 %910 }
 0x66a   :  { %v919_v33 = vmul.f32 %v915_v32, %v911_v51 }
 0x66c   :  { %v927_v36 = vsel %vm881_vm11, %v919_v33, 0.0 }
 0x66d   :  { %v989_v24 = vpop.permute.xlu0 %988  ;;  %v928_v40 = vrot.slane %v927_v36, 4 }
 0x66e   :  { %v994_v58 = vsel %vm71_vm2, %v1427_v37, %v989_v24  ;;  %v886_v37 = vadd.f32 %v885_v53, %v884_v48 }
 0x66f   :  { %996 = vst.msk [vmem:[%s1518_s14] sm:$0xff] %vm68_vm4, %v994_v58  ;;  %v929_v4 = vadd.f32 %v928_v40, %v927_v36 }
 0x670   :  { %v887_v63 = vrot.slane %v886_v37, 1 }
 0x671   :  { %v930_v49 = vrot.slane %v929_v4, 2 }
 0x672   :  { %v888_v38 = vadd.f32 %v887_v63, %v886_v37 }
 0x673   :  { %v1163_v25 = vpop.eup %1162  ;;  %v931_v54 = vadd.f32 %v930_v49, %v929_v4 }
 0x674   :  { %v983_v62 = vmul.f32 0.6931472, %v1163_v25  ;;  %v943_v8 = vsel %vm817_vm8, %v895_v3, %v888_v38 }
 0x675   :  { %v932_v57 = vrot.slane %v931_v54, 1  ;;  %v945_v10 = vmul.f32 %v943_v8, %v939_v61 }
 0x676   :  { %v984_v26 = vadd.f32 %v983_v62, %v975_v42 }
 0x677   :  { %v933_v1 = vadd.f32 %v932_v57, %v931_v54 }
 0x678   :  { %v985_v27 = vsub.f32 %v971_v5, %v984_v26 }
 0x679   :  { %v952_v5 = vsel %vm817_vm8, %v933_v1, %v926_v2 }
 0x67a   :  { %1003 = vrot.lane.b32.xlu1 %v985_v27, %s1220_s27  ;;  %v954_v9 = vmul.f32 %v952_v5, %v948_v6 }
 0x67c   :  { %v955_v12 = vadd.f32 %v954_v9, %v945_v10 }
 0x67e   :  { %990 = vrot.lane.b32.xlu1 %v1471_v15, %s1219_s1  ;;  %v1006_v13 = vsel %vm68_vm4, %v955_v12, %v1000_v11 }
 0x6ec   :  { %v1004_v14 = vpop.permute.xlu1 %1003 }
 0x6ed   :  { %v1008_v16 = vsel %vm1007_vm12, %v1006_v13, %v1004_v14 }
 0x6ee   :  { %v1010_v42 = vsel %vm1009_vm13, %v1008_v16, 0.0 }
 0x6ef   :  { %1011 = vst [vmem:[#allocation5] sm:$0x3] %v1010_v42 }
 0x6f0   :  { %v991_v17 = vpop.permute.xlu1 %990 }
 0x6f1   :  { %1195 = shalt.err (!%p1192_p9)
}
 0x6f2   :  { %1021 = dma.vmem_to_hbm [thread:$0]  %s1019_s4, 32, %s1517_s13, [#allocation4]   ;;  %v995_v18 = vsel %vm71_vm2, %v1471_v15, %v991_v17 }
 0x6f3   :  { %997 = vst.msk [vmem:[%s1518_s14 + $0x8] sm:$0xff] %vm68_vm4, %v995_v18 }
 0x6f4   :  { %1206 = dma.done.wait [#allocation4], 32  }
 0x6f5   :  { %1207 = vsyncadd [#allocation4], 4294967264 }
 0x6f6   :  { %1029 = vsyncpa [#allocation3], 1 }
 0x6f7   :  { %1030 = vsyncpa [#allocation4], 1 }

</bundles_post_ra>
